<compile_context>
chip_gen: v7x
topology: tpu7x:2x2x1
jax: 0.10.0
libtpu: 0.0.40
codegen_flags: <defaults>
</compile_context>

<pallas_src>
import jax
import jax.numpy as jnp
from jax import lax
from jax.experimental import pallas as pl
from jax.experimental.pallas import tpu as pltpu

LANE = 128


def _round_up(x: int, m: int) -> int:
    return (x + m - 1) // m * m


def _vmem_capacity_bytes() -> int:
    try:
        return int(pltpu.get_tpu_info().vmem_capacity_bytes)
    except Exception:
        return 64 * 1024 * 1024  # conservative: v7x per-TensorCore VMEM


def _pick_batch_tile(batch: int) -> int:
    """Large, sublane-dense (bf16 => multiple of 16) batch tile.

    Small batches get a single tile; larger batches are split into >= 2 tiles (so the
    'parallel' grid axis can span both TensorCores on v7x), each as big as possible
    (cap 1024, 256-aligned) to amortize fixed per-grid-step overhead and hide DMA.
    """
    if batch <= 256:
        return _round_up(max(batch, 1), 16)
    return min(1024, _round_up(pl.cdiv(batch, 2), 256))


def prepare_params(params):
    """One-time packing of PyTorch-layout params [(W(out,in), b(out,)), ...].

    Hoisted out of the forward pass: re-transposing / padding / casting every weight on
    every call costs a full HBM pass over the parameters as separate XLA ops.
    """
    (W0, B0) = params[0]
    mids = list(params[1:-1])
    (WL, BL) = params[-1]

    mdims, dims = W0.shape
    num = len(mids)
    dims_p = _round_up(dims, LANE)

    w0 = jnp.pad(jnp.asarray(W0, jnp.float32).T,
                 ((0, dims_p - dims), (0, 0))).astype(jnp.bfloat16)        # (dims_p, mdims)
    b0 = jnp.asarray(B0, jnp.float32).reshape(1, mdims)                    # (1, mdims)

    if num > 0:
        wm = jnp.stack([jnp.asarray(w, jnp.float32).T for (w, _) in mids]
                       ).astype(jnp.bfloat16)                              # (num, mdims, mdims)
        bm = jnp.stack([jnp.asarray(b, jnp.float32).reshape(1, mdims)
                        for (_, b) in mids])                               # (num, 1, mdims)
    else:  # dummy (unused) stack so the kernel signature stays uniform
        wm = jnp.zeros((1, mdims, mdims), jnp.bfloat16)
        bm = jnp.zeros((1, 1, mdims), jnp.float32)

    wl = jnp.pad(jnp.asarray(WL, jnp.float32).T,
                 ((0, 0), (0, dims_p - dims))).astype(jnp.bfloat16)        # (mdims, dims_p)
    bl = jnp.pad(jnp.asarray(BL, jnp.float32).reshape(1, dims),
                 ((0, 0), (0, dims_p - dims)))                             # (1, dims_p)

    return {"w0": w0, "b0": b0, "wm": wm, "bm": bm, "wl": wl, "bl": bl,
            "dims": dims, "mdims": mdims, "num": num, "dims_p": dims_p}


def _resident_kernel(num):
    """All weights VMEM-resident; the layer stack is applied in an in-kernel loop.

    x_ref : (TB, dims_p) bf16          w0_ref: (dims_p, mdims) bf16   b0_ref: (1, mdims) f32
    wm_ref: (max(num,1), mdims, mdims) bf16    bm_ref: (max(num,1), 1, mdims) f32
    wl_ref: (mdims, dims_p) bf16       bl_ref: (1, dims_p) f32
    o_ref : (TB, dims_p) f32           h_ref : (TB, mdims) bf16 scratch
    """
    def kernel(x_ref, w0_ref, b0_ref, wm_ref, bm_ref, wl_ref, bl_ref, o_ref, h_ref):
        h0 = jnp.dot(x_ref[...], w0_ref[...],
                     preferred_element_type=jnp.float32) + b0_ref[...]
        h_ref[...] = h0.astype(jnp.bfloat16)

        def apply_layer(l):
            hl = jnp.dot(h_ref[...], wm_ref[l],
                         preferred_element_type=jnp.float32) + bm_ref[l]
            h_ref[...] = hl.astype(jnp.bfloat16)

        if num > 0:
            if num <= 16:                       # shallow stacks: fully unrolled, static indices
                for l in range(num):
                    apply_layer(l)
            else:                               # deep stacks: rolled loop, dynamic index
                def body(l, carry):
                    apply_layer(l)
                    return carry
                lax.fori_loop(0, num, body, 0)

        o_ref[...] = (jnp.dot(h_ref[...], wl_ref[...],
                              preferred_element_type=jnp.float32)
                      + bl_ref[...]).astype(o_ref.dtype)
    return kernel


def _streaming_kernel(x_ref, w0_ref, b0_ref, wm_ref, bm_ref, wl_ref, bl_ref,
                      o_ref, h_ref):
    """Fallback: one grid step = one middle layer (first/last fused at the ends).

    wm_ref is the streamed per-layer weight (1, mdims, mdims) (double-buffered by the
    pipeliner); bm_ref is the full resident bias stack (num, 1, mdims).  h_ref (bf16)
    persists across the layer axis of the grid.
    """
    k = pl.program_id(1)

    @pl.when(k == 0)
    def _():
        h0 = jnp.dot(x_ref[...], w0_ref[...],
                     preferred_element_type=jnp.float32) + b0_ref[...]
        h_ref[...] = h0.astype(jnp.bfloat16)

    hk = jnp.dot(h_ref[...], wm_ref[0],
                 preferred_element_type=jnp.float32) + bm_ref[k]
    h_ref[...] = hk.astype(jnp.bfloat16)

    @pl.when(k == pl.num_programs(1) - 1)
    def _():
        o_ref[...] = (jnp.dot(h_ref[...], wl_ref[...],
                              preferred_element_type=jnp.float32)
                      + bl_ref[...]).astype(o_ref.dtype)


def mini_model_forward(x, prep, *, force_stream=False):
    """y = Linear(dims->mdims) -> num x Linear(mdims->mdims) -> Linear(mdims->dims)."""
    B, dims = x.shape
    assert dims == prep["dims"]
    dims_p, mdims, num = prep["dims_p"], prep["mdims"], prep["num"]
    w0, b0, wm, bm, wl, bl = (prep[k] for k in ("w0", "b0", "wm", "bm", "wl", "bl"))

    TB = _pick_batch_tile(B)
    B_p = _round_up(B, TB)
    n_btiles = B_p // TB

    x_p = jnp.pad(x, ((0, B_p - B), (0, dims_p - dims))).astype(jnp.bfloat16)

    cap = _vmem_capacity_bytes()
    vmem_limit = max(32 << 20, min(int(cap * 0.75), 100 << 20))

    # Can the whole middle weight/bias stack live in VMEM alongside the resident
    # first/last weights, double-buffered x/out tiles and the hidden carry?
    est_resident = (num * mdims * mdims * 2            # wm stack (bf16)
                    + num * 8 * mdims * 4              # bm stack (sublane-padded f32)
                    + 2 * dims_p * mdims * 2 * 2       # w0 + wl (x2 pipeliner buffers)
                    + TB * dims_p * (2 + 4) * 2        # x + out tiles (x2 buffers)
                    + TB * mdims * 2)                  # hidden carry (bf16)
    use_resident = (num == 0) or ((not force_stream) and est_resident <= int(cap * 0.6))

    flops = 2 * B_p * mdims * (dims_p + num * mdims + dims_p)
    bytes_accessed = int(x_p.size * 2 + w0.size * 2 + wm.size * 2 + wl.size * 2
                         + (b0.size + bm.size + bl.size) * 4 + B_p * dims_p * 4)
    cost = pl.CostEstimate(flops=flops, transcendentals=0, bytes_accessed=bytes_accessed)
    num_eff = max(num, 1)

    if use_resident:
        out_p = pl.pallas_call(
            _resident_kernel(num),
            out_shape=jax.ShapeDtypeStruct((B_p, dims_p), jnp.float32),
            grid=(n_btiles,),
            in_specs=[
                pl.BlockSpec((TB, dims_p), lambda b: (b, 0)),                # x (per batch tile)
                pl.BlockSpec((dims_p, mdims), lambda b: (0, 0)),             # W0^T   (resident)
                pl.BlockSpec((1, mdims), lambda b: (0, 0)),                  # b0     (resident)
                pl.BlockSpec((num_eff, mdims, mdims), lambda b: (0, 0, 0)),  # mid W^T stack (resident)
                pl.BlockSpec((num_eff, 1, mdims), lambda b: (0, 0, 0)),      # mid b  stack  (resident)
                pl.BlockSpec((mdims, dims_p), lambda b: (0, 0)),             # Wlast^T (resident)
                pl.BlockSpec((1, dims_p), lambda b: (0, 0)),                 # blast   (resident)
            ],
            out_specs=pl.BlockSpec((TB, dims_p), lambda b: (b, 0)),
            scratch_shapes=[pltpu.VMEM((TB, mdims), jnp.bfloat16)],          # bf16 hidden carry
            compiler_params=pltpu.CompilerParams(
                dimension_semantics=("parallel",),
                vmem_limit_bytes=vmem_limit),
            cost_estimate=cost,
        )(x_p, w0, b0, wm, bm, wl, bl)
    else:
        out_p = pl.pallas_call(
            _streaming_kernel,
            out_shape=jax.ShapeDtypeStruct((B_p, dims_p), jnp.float32),
            grid=(n_btiles, num),
            in_specs=[
                pl.BlockSpec((TB, dims_p), lambda b, k: (b, 0)),             # x (resident over k)
                pl.BlockSpec((dims_p, mdims), lambda b, k: (0, 0)),          # W0^T
                pl.BlockSpec((1, mdims), lambda b, k: (0, 0)),               # b0
                pl.BlockSpec((1, mdims, mdims), lambda b, k: (k, 0, 0)),     # mid W^T, streamed per layer
                pl.BlockSpec((num, 1, mdims), lambda b, k: (0, 0, 0)),       # mid b stack, resident
                pl.BlockSpec((mdims, dims_p), lambda b, k: (0, 0)),          # Wlast^T
                pl.BlockSpec((1, dims_p), lambda b, k: (0, 0)),              # blast
            ],
            out_specs=pl.BlockSpec((TB, dims_p), lambda b, k: (b, 0)),
            scratch_shapes=[pltpu.VMEM((TB, mdims), jnp.bfloat16)],          # bf16 hidden carry
            compiler_params=pltpu.CompilerParams(
                dimension_semantics=("parallel", "arbitrary"),
                vmem_limit_bytes=vmem_limit),
            cost_estimate=cost,
        )(x_p, w0, b0, wm, bm, wl, bl)

    return out_p[:B, :dims]


def init_linear(key, in_f, out_f):
    """Deterministic PyTorch-style Linear init: U(-1/sqrt(in), 1/sqrt(in))."""
    kw, kb = jax.random.split(key)
    bound = 1.0 / jnp.sqrt(jnp.float32(in_f))
    w = jax.random.uniform(kw, (out_f, in_f), jnp.float32, -bound, bound)
    b = jax.random.uniform(kb, (out_f,), jnp.float32, -bound, bound)
    return w, b


if __name__ == "__main__":
    # Small shapes consistent with the module: dims=3 (as in demo.py), hidden mdims=128,
    # num=2 middle layers, batch=2.
    dims, mdims, num, batch = 3, 128, 2, 2

    root = jax.random.PRNGKey(0)
    keys = jax.random.split(root, num + 3)

    W0, B0 = init_linear(keys[0], dims, mdims)
    mids = [init_linear(keys[1 + i], mdims, mdims) for i in range(num)]
    WL, BL = init_linear(keys[num + 1], mdims, dims)
    params = [(W0, B0)] + mids + [(WL, BL)]

    x = jax.random.uniform(keys[num + 2], (batch, dims), jnp.float32)

    prep = prepare_params(params)  # one-time (load-time) weight packing

    out = jax.block_until_ready(mini_model_forward(x, prep))                       # resident path
    out_stream = jax.block_until_ready(mini_model_forward(x, prep,
                                                          force_stream=True))      # streaming fallback

    # Reference 1: mixed precision matching the kernel (bf16 matmul inputs, f32 accumulate).
    def mm(a, w):
        return jnp.dot(a.astype(jnp.bfloat16), w.T.astype(jnp.bfloat16),
                       preferred_element_type=jnp.float32)

    ref = mm(x, W0) + B0
    for (w, b) in mids:
        ref = mm(ref, w) + b
    ref = mm(ref, WL) + BL

    # Reference 2: full-f32 module semantics (loose check; bf16 quantization drift).
    ref_f32 = x @ W0.T + B0
    for (w, b) in mids:
        ref_f32 = ref_f32 @ w.T + b
    ref_f32 = ref_f32 @ WL.T + BL

    assert out.shape == (batch, dims)
    assert jnp.allclose(out, out_stream, atol=1e-4, rtol=1e-4), "resident vs streaming mismatch"
    assert jnp.allclose(out, ref, atol=1e-2, rtol=1e-2), "mismatch vs mixed-precision reference"
    assert jnp.allclose(out, ref_f32, atol=1e-1, rtol=1e-1), "mismatch vs f32 reference"
    print("KERNEL_OK")
</pallas_src>

<mosaic_0001>
module attributes {stable_mosaic.version = 11 : i64} {
  func.func @kernel(%arg0: i32, %arg1: memref<16x128xbf16, #tpu.memory_space<vmem>>, %arg2: memref<128x128xbf16, #tpu.memory_space<vmem>>, %arg3: memref<1x128xf32, #tpu.memory_space<vmem>>, %arg4: memref<2x128x128xbf16, #tpu.memory_space<vmem>>, %arg5: memref<2x1x128xf32, #tpu.memory_space<vmem>>, %arg6: memref<128x128xbf16, #tpu.memory_space<vmem>>, %arg7: memref<1x128xf32, #tpu.memory_space<vmem>>, %arg8: memref<16x128xf32, #tpu.memory_space<vmem>>, %arg9: memref<16x128xbf16, #tpu.memory_space<vmem>>) attributes {dimension_semantics = [#tpu.dimension_semantics<parallel>], iteration_bounds = array<i64: 1>, scalar_prefetch = 0 : i64, scratch_operands = 1 : i64, tpu.core_type = #tpu.core_type<tc>, window_params = [{transform_indices = @transform_0, window_bounds = array<i64: 16, 128>}, {pipeline_mode = #tpu.pipeline_mode<synchronous>, transform_indices = @transform_1, window_bounds = array<i64: 128, 128>}, {pipeline_mode = #tpu.pipeline_mode<synchronous>, transform_indices = @transform_2, window_bounds = array<i64: 1, 128>}, {pipeline_mode = #tpu.pipeline_mode<synchronous>, transform_indices = @transform_3, window_bounds = array<i64: 2, 128, 128>}, {pipeline_mode = #tpu.pipeline_mode<synchronous>, transform_indices = @transform_4, window_bounds = array<i64: 2, 1, 128>}, {pipeline_mode = #tpu.pipeline_mode<synchronous>, transform_indices = @transform_5, window_bounds = array<i64: 128, 128>}, {pipeline_mode = #tpu.pipeline_mode<synchronous>, transform_indices = @transform_6, window_bounds = array<i64: 1, 128>}, {transform_indices = @transform_7, window_bounds = array<i64: 16, 128>}]} {
    %c0 = arith.constant 0 : index
    %c0_0 = arith.constant 0 : index
    %0 = vector.load %arg1[%c0, %c0_0] : memref<16x128xbf16, #tpu.memory_space<vmem>>, vector<16x128xbf16>
    %c0_1 = arith.constant 0 : index
    %c0_2 = arith.constant 0 : index
    %1 = vector.load %arg2[%c0_1, %c0_2] : memref<128x128xbf16, #tpu.memory_space<vmem>>, vector<128x128xbf16>
    %cst = arith.constant dense<0.000000e+00> : vector<16x128xf32>
    %2 = tpu.matmul %0, %1, %cst {dimension_numbers = #tpu.dot_dimension_numbers<[1], [0], [0], [1], [0, 0, 1, 1], [], []>} : vector<16x128xbf16>, vector<128x128xbf16>, vector<16x128xf32> -> vector<16x128xf32>
    %c0_3 = arith.constant 0 : index
    %c0_4 = arith.constant 0 : index
    %3 = vector.load %arg3[%c0_3, %c0_4] : memref<1x128xf32, #tpu.memory_space<vmem>>, vector<1x128xf32>
    %4 = vector.broadcast %3 : vector<1x128xf32> to vector<16x128xf32>
    %5 = arith.addf %2, %4 : vector<16x128xf32>
    %6 = arith.truncf %5 : vector<16x128xf32> to vector<16x128xbf16>
    %c0_5 = arith.constant 0 : index
    %c0_6 = arith.constant 0 : index
    %7 = vector.load %arg9[%c0_5, %c0_6] : memref<16x128xbf16, #tpu.memory_space<vmem>>, vector<16x128xbf16>
    tpu.vector_store %arg9[%c0_5, %c0_6], %6 {strides = array<i32>} : memref<16x128xbf16, #tpu.memory_space<vmem>>, vector<16x128xbf16>,
    %c0_7 = arith.constant 0 : index
    %c0_8 = arith.constant 0 : index
    %8 = vector.load %arg9[%c0_7, %c0_8] : memref<16x128xbf16, #tpu.memory_space<vmem>>, vector<16x128xbf16>
    %c0_9 = arith.constant 0 : index
    %c0_10 = arith.constant 0 : index
    %c0_11 = arith.constant 0 : index
    %9 = vector.load %arg4[%c0_9, %c0_10, %c0_11] : memref<2x128x128xbf16, #tpu.memory_space<vmem>>, vector<1x128x128xbf16>
    %10 = vector.shape_cast %9 : vector<1x128x128xbf16> to vector<128x128xbf16>
    %cst_12 = arith.constant dense<0.000000e+00> : vector<16x128xf32>
    %11 = tpu.matmul %8, %10, %cst_12 {dimension_numbers = #tpu.dot_dimension_numbers<[1], [0], [0], [1], [0, 0, 1, 1], [], []>} : vector<16x128xbf16>, vector<128x128xbf16>, vector<16x128xf32> -> vector<16x128xf32>
    %c0_13 = arith.constant 0 : index
    %c0_14 = arith.constant 0 : index
    %c0_15 = arith.constant 0 : index
    %12 = vector.load %arg5[%c0_13, %c0_14, %c0_15] : memref<2x1x128xf32, #tpu.memory_space<vmem>>, vector<1x1x128xf32>
    %13 = vector.shape_cast %12 : vector<1x1x128xf32> to vector<1x128xf32>
    %14 = vector.broadcast %13 : vector<1x128xf32> to vector<16x128xf32>
    %15 = arith.addf %11, %14 : vector<16x128xf32>
    %16 = arith.truncf %15 : vector<16x128xf32> to vector<16x128xbf16>
    %c0_16 = arith.constant 0 : index
    %c0_17 = arith.constant 0 : index
    %17 = vector.load %arg9[%c0_16, %c0_17] : memref<16x128xbf16, #tpu.memory_space<vmem>>, vector<16x128xbf16>
    tpu.vector_store %arg9[%c0_16, %c0_17], %16 {strides = array<i32>} : memref<16x128xbf16, #tpu.memory_space<vmem>>, vector<16x128xbf16>,
    %c0_18 = arith.constant 0 : index
    %c0_19 = arith.constant 0 : index
    %18 = vector.load %arg9[%c0_18, %c0_19] : memref<16x128xbf16, #tpu.memory_space<vmem>>, vector<16x128xbf16>
    %c1 = arith.constant 1 : index
    %c0_20 = arith.constant 0 : index
    %c0_21 = arith.constant 0 : index
    %19 = vector.load %arg4[%c1, %c0_20, %c0_21] : memref<2x128x128xbf16, #tpu.memory_space<vmem>>, vector<1x128x128xbf16>
    %20 = vector.shape_cast %19 : vector<1x128x128xbf16> to vector<128x128xbf16>
    %cst_22 = arith.constant dense<0.000000e+00> : vector<16x128xf32>
    %21 = tpu.matmul %18, %20, %cst_22 {dimension_numbers = #tpu.dot_dimension_numbers<[1], [0], [0], [1], [0, 0, 1, 1], [], []>} : vector<16x128xbf16>, vector<128x128xbf16>, vector<16x128xf32> -> vector<16x128xf32>
    %c1_23 = arith.constant 1 : index
    %c0_24 = arith.constant 0 : index
    %c0_25 = arith.constant 0 : index
    %22 = vector.load %arg5[%c1_23, %c0_24, %c0_25] : memref<2x1x128xf32, #tpu.memory_space<vmem>>, vector<1x1x128xf32>
    %23 = vector.shape_cast %22 : vector<1x1x128xf32> to vector<1x128xf32>
    %24 = vector.broadcast %23 : vector<1x128xf32> to vector<16x128xf32>
    %25 = arith.addf %21, %24 : vector<16x128xf32>
    %26 = arith.truncf %25 : vector<16x128xf32> to vector<16x128xbf16>
    %c0_26 = arith.constant 0 : index
    %c0_27 = arith.constant 0 : index
    %27 = vector.load %arg9[%c0_26, %c0_27] : memref<16x128xbf16, #tpu.memory_space<vmem>>, vector<16x128xbf16>
    tpu.vector_store %arg9[%c0_26, %c0_27], %26 {strides = array<i32>} : memref<16x128xbf16, #tpu.memory_space<vmem>>, vector<16x128xbf16>,
    %c0_28 = arith.constant 0 : index
    %c0_29 = arith.constant 0 : index
    %28 = vector.load %arg9[%c0_28, %c0_29] : memref<16x128xbf16, #tpu.memory_space<vmem>>, vector<16x128xbf16>
    %c0_30 = arith.constant 0 : index
    %c0_31 = arith.constant 0 : index
    %29 = vector.load %arg6[%c0_30, %c0_31] : memref<128x128xbf16, #tpu.memory_space<vmem>>, vector<128x128xbf16>
    %cst_32 = arith.constant dense<0.000000e+00> : vector<16x128xf32>
    %30 = tpu.matmul %28, %29, %cst_32 {dimension_numbers = #tpu.dot_dimension_numbers<[1], [0], [0], [1], [0, 0, 1, 1], [], []>} : vector<16x128xbf16>, vector<128x128xbf16>, vector<16x128xf32> -> vector<16x128xf32>
    %c0_33 = arith.constant 0 : index
    %c0_34 = arith.constant 0 : index
    %31 = vector.load %arg7[%c0_33, %c0_34] : memref<1x128xf32, #tpu.memory_space<vmem>>, vector<1x128xf32>
    %32 = vector.broadcast %31 : vector<1x128xf32> to vector<16x128xf32>
    %33 = arith.addf %30, %32 : vector<16x128xf32>
    %c0_35 = arith.constant 0 : index
    %c0_36 = arith.constant 0 : index
    %34 = vector.load %arg8[%c0_35, %c0_36] : memref<16x128xf32, #tpu.memory_space<vmem>>, vector<16x128xf32>
    tpu.vector_store %arg8[%c0_35, %c0_36], %33 {strides = array<i32>} : memref<16x128xf32, #tpu.memory_space<vmem>>, vector<16x128xf32>,
    return
  }
  func.func @transform_0(%arg0: i32) -> (i32, i32) {
    %c0_i32 = arith.constant 0 : i32
    %c0_i32_0 = arith.constant 0 : i32
    return %arg0, %c0_i32 : i32, i32
  }
  func.func @transform_1(%arg0: i32) -> (i32, i32) {
    %c0_i32 = arith.constant 0 : i32
    %c0_i32_0 = arith.constant 0 : i32
    %c0_i32_1 = arith.constant 0 : i32
    return %c0_i32, %c0_i32_0 : i32, i32
  }
  func.func @transform_2(%arg0: i32) -> (i32, i32) {
    %c0_i32 = arith.constant 0 : i32
    %c0_i32_0 = arith.constant 0 : i32
    %c0_i32_1 = arith.constant 0 : i32
    return %c0_i32, %c0_i32_0 : i32, i32
  }
  func.func @transform_3(%arg0: i32) -> (i32, i32, i32) {
    %c0_i32 = arith.constant 0 : i32
    %c0_i32_0 = arith.constant 0 : i32
    %c0_i32_1 = arith.constant 0 : i32
    %c0_i32_2 = arith.constant 0 : i32
    return %c0_i32, %c0_i32_0, %c0_i32_1 : i32, i32, i32
  }
  func.func @transform_4(%arg0: i32) -> (i32, i32, i32) {
    %c0_i32 = arith.constant 0 : i32
    %c0_i32_0 = arith.constant 0 : i32
    %c0_i32_1 = arith.constant 0 : i32
    %c0_i32_2 = arith.constant 0 : i32
    return %c0_i32, %c0_i32_0, %c0_i32_1 : i32, i32, i32
  }
  func.func @transform_5(%arg0: i32) -> (i32, i32) {
    %c0_i32 = arith.constant 0 : i32
    %c0_i32_0 = arith.constant 0 : i32
    %c0_i32_1 = arith.constant 0 : i32
    return %c0_i32, %c0_i32_0 : i32, i32
  }
  func.func @transform_6(%arg0: i32) -> (i32, i32) {
    %c0_i32 = arith.constant 0 : i32
    %c0_i32_0 = arith.constant 0 : i32
    %c0_i32_1 = arith.constant 0 : i32
    return %c0_i32, %c0_i32_0 : i32, i32
  }
  func.func @transform_7(%arg0: i32) -> (i32, i32) {
    %c0_i32 = arith.constant 0 : i32
    %c0_i32_0 = arith.constant 0 : i32
    return %arg0, %c0_i32 : i32, i32
  }
}

</mosaic_0001>

<bundles_post_ra>
// kernel: tpu_custom_call.1
= control target key start
LH: loop header
LB: loop body
LE: loop exit
PB: predicated region body
PF: predicated region fallthrough
CT: control target
= control target key end

     0   :  { %12 = vsyncpa [#allocation4], 0  ;;  %s1076_s0 = inlined_call_operand.hbm [shape: bf16[16,128], index: 0, kind: input, shape index: {}]   ;;  %s1077_s1 = inlined_call_operand.hbm [shape: bf16[128,128], index: 1, kind: input, shape index: {}]   ;;  %s1078_s2 = inlined_call_operand.vmem [shape: f32[1,128], index: 2, kind: input, shape index: {}]   ;;  %s1079_s3 = inlined_call_operand.hbm [shape: bf16[2,128,128], index: 3, kind: input, shape index: {}]   ;;  %s1080_s4 = inlined_call_operand.vmem [shape: f32[2,1,128], index: 4, kind: input, shape index: {}]   ;;  %s1081_s5 = inlined_call_operand.hbm [shape: bf16[128,128], index: 5, kind: input, shape index: {}]   ;;  %s1082_s6 = inlined_call_operand.vmem [shape: f32[1,128], index: 6, kind: input, shape index: {}]   ;;  %s1083_s7 = inlined_call_operand.hbm [shape: f32[16,128], index: 7, kind: output, shape index: {}]  }
   0x1   :  { %13 = vsyncpa [#allocation7], 0 }
   0x2   :  { %14 = vsyncpa [#allocation10], 0 }
   0x3   :  { %15 = vsyncpa [#allocation5], 0  ;;  %s887_s24 = smov [#allocation6]   ;;  %s888_s26 = smov [#allocation3]  }
   0x4   :  { %s33_s25 = sshll.u32 %s887_s24, 4  ;;  %s21_s27 = sshll.u32 %s888_s26, 4  ;;  %s34_s25 = int_to_ptr.vmem [resolvable:$true] %s33_s25  ;;  %s938_s27 = int_to_ptr.vmem [resolvable:$true] %s21_s27 }
   0x5   :  { %s769_s30 = scalar_lea.hbm %s1077_s1, 1024 }
   0x6   :  { %p770_p0 = scmp.ne.s32.totalorder %s1077_s1, %s769_s30  ;;  %p773_p1 = scmp.lt.u32.totalorder %s769_s30, %s1077_s1 }
   0x8   :  { %p775_p2 = pnand %p773_p1, %p770_p0 }
   0xa   :  { %778 = shalt.err (!%p775_p2)
}
   0xb   :  { %s779_s12 = scalar_lea.vmem %s34_s25, 1024  ;;  %p784_p4 = scmp.lt.s32.totalorder %s34_s25, %s34_s25 }
   0xc   :  { %p780_p3 = scmp.ne.s32.totalorder %s34_s25, %s779_s12  ;;  %p785_p5 = scmp.lt.s32.totalorder %s779_s12, %s779_s12 }
   0xe   :  { %p786_p6 = por %p785_p5, %p784_p4 }
  0x10   :  { %p787_p7 = pnand %p786_p6, %p780_p3 }
  0x12   :  { %790 = shalt.err (!%p787_p7)
}
  0x13   :  { %s889_s13 = smov 64   ;;  %s890_s14 = smov 4  }
  0x14   :  { %39 = dma.hbm_to_vmem [thread:$0]  %s1077_s1, 1024, %s34_s25, [#allocation7], %s889_s13, %s889_s13, %s890_s14  }
  0x15   :  { %s791_s19 = scalar_lea.hbm %s1076_s0, 128 }
  0x16   :  { %p792_p8 = scmp.ne.s32.totalorder %s1076_s0, %s791_s19  ;;  %p795_p9 = scmp.lt.u32.totalorder %s791_s19, %s1076_s0 }
  0x18   :  { %p797_p10 = pnand %p795_p9, %p792_p8 }
  0x1a   :  { %800 = shalt.err (!%p797_p10)
}
  0x1b   :  { %s801_s24 = scalar_lea.vmem %s938_s27, 128  ;;  %p806_p12 = scmp.lt.s32.totalorder %s938_s27, %s938_s27 }
  0x1c   :  { %p802_p11 = scmp.ne.s32.totalorder %s938_s27, %s801_s24  ;;  %p807_p13 = scmp.lt.s32.totalorder %s801_s24, %s801_s24 }
  0x1e   :  { %p808_p0 = por %p807_p13, %p806_p12 }
  0x20   :  { %p809_p1 = pnand %p808_p0, %p802_p11 }
  0x22   :  { %812 = shalt.err (!%p809_p1)
}
  0x23   :  { %27 = dma.hbm_to_vmem [thread:$0]  %s1076_s0, 128, %s938_s27, [#allocation4], %s889_s13, %s889_s13, %s890_s14  }
  0x24   :  { %s891_s26 = smov [#allocation8]   ;;  %s892_s29 = smov [#allocation9]  }
  0x25   :  { %s47_s28 = sshll.u32 %s891_s26, 4  ;;  %s61_s30 = sshll.u32 %s892_s29, 4  ;;  %s48_s28 = int_to_ptr.vmem [resolvable:$true] %s47_s28  ;;  %s975_s30 = int_to_ptr.vmem [resolvable:$true] %s61_s30 }
  0x26   :  { %s813_s10 = scalar_lea.hbm %s1079_s3, 2048 }
  0x27   :  { %p814_p2 = scmp.ne.s32.totalorder %s1079_s3, %s813_s10  ;;  %p817_p3 = scmp.lt.u32.totalorder %s813_s10, %s1079_s3 }
  0x29   :  { %p819_p4 = pnand %p817_p3, %p814_p2 }
  0x2b   :  { %822 = shalt.err (!%p819_p4)
}
  0x2c   :  { %s823_s0 = scalar_lea.vmem %s48_s28, 2048  ;;  %p828_p6 = scmp.lt.s32.totalorder %s48_s28, %s48_s28 }
  0x2d   :  { %p824_p5 = scmp.ne.s32.totalorder %s48_s28, %s823_s0  ;;  %p829_p7 = scmp.lt.s32.totalorder %s823_s0, %s823_s0 }
  0x2f   :  { %p830_p8 = por %p829_p7, %p828_p6 }
  0x31   :  { %p831_p9 = pnand %p830_p8, %p824_p5 }
  0x33   :  { %834 = shalt.err (!%p831_p9)
}
  0x34   :  { %53 = dma.hbm_to_vmem [thread:$0]  %s1079_s3, 2048, %s48_s28, [#allocation7], %s889_s13, %s889_s13, %s890_s14  }
  0x35   :  { %s835_s20 = scalar_lea.hbm %s1081_s5, 1024 }
  0x36   :  { %p836_p10 = scmp.ne.s32.totalorder %s1081_s5, %s835_s20  ;;  %p839_p11 = scmp.lt.u32.totalorder %s835_s20, %s1081_s5 }
  0x38   :  { %p841_p12 = pnand %p839_p11, %p836_p10 }
  0x3a   :  { %844 = shalt.err (!%p841_p12)
}
  0x3b   :  { %s845_s1 = scalar_lea.vmem %s975_s30, 1024  ;;  %p850_p0 = scmp.lt.s32.totalorder %s975_s30, %s975_s30 }
  0x3c   :  { %p846_p13 = scmp.ne.s32.totalorder %s975_s30, %s845_s1  ;;  %p851_p1 = scmp.lt.s32.totalorder %s845_s1, %s845_s1 }
  0x3e   :  { %p852_p2 = por %p851_p1, %p850_p0 }
  0x40   :  { %p853_p3 = pnand %p852_p2, %p846_p13 }
  0x42   :  { %856 = shalt.err (!%p853_p3)
}
  0x43   :  { %67 = dma.hbm_to_vmem [thread:$0]  %s1081_s5, 1024, %s975_s30, [#allocation10], %s889_s13, %s889_s13, %s890_s14  }
  0x44   :  { %879 = dma.done.wait [#allocation4], 128  }
  0x45   :  { %880 = vsyncadd [#allocation4], 4294967168 }
  0x46   :  { %881 = dma.done.wait [#allocation7], 3072  }
  0x47   :  { %882 = vsyncadd [#allocation7], 4294964224 }
  0x48   :  { %883 = dma.done.wait [#allocation10], 1024  }
  0x49   :  { %884 = vsyncadd [#allocation10], 4294966272  ;;  %v893_v0 = vmov 0.0   ;;  %vm894_vm0 = vmmov 0   ;;  %v736_v1 = vld [vmem:[#allocation6] sm:$0xff]   ;;  %v737_v2 = vld [vmem:[#allocation6 + $0x8] sm:$0xff]  }
  0x4a   :  { %645 = vmatprep.subr.bf16.mxu0 %v893_v0  ;;  %661 = vmatprep.mubr.msk.bf16.mxu0 %vm894_vm0, %v893_v0  ;;  %v738_v3 = vld [vmem:[#allocation6 + $0x10] sm:$0xff]   ;;  %v745_v4 = vld [vmem:[#allocation8] sm:$0xff]   ;;  %v739_v5 = vld [vmem:[#allocation6 + $0x18] sm:$0xff]   ;;  %s895_s8 = smov [#allocation11]  }
  0x4b   :  { %665 = vmatprep.subr.bf16.mxu1 %v893_v0  ;;  %681 = vmatprep.mubr.msk.bf16.mxu1 %vm894_vm0, %v893_v0  ;;  %v746_v6 = vld [vmem:[#allocation8 + $0x8] sm:$0xff]   ;;  %v740_v7 = vld [vmem:[#allocation6 + $0x20] sm:$0xff]   ;;  %v747_v8 = vld [vmem:[#allocation8 + $0x10] sm:$0xff]   ;;  %s557_s9 = sshll.u32 %s895_s8, 4  ;;  %s558_s9 = int_to_ptr.vmem [resolvable:$true] %s557_s9 }
  0x4c   :  { %646 = vmatpush3.bf16.msra.mxu0 %v736_v1  ;;  %666 = vmatpush3.bf16.msra.mxu1 %v745_v4  ;;  %v741_v9 = vld [vmem:[#allocation6 + $0x28] sm:$0xff]   ;;  %v748_v10 = vld [vmem:[#allocation8 + $0x18] sm:$0xff]   ;;  %v742_v11 = vld [vmem:[#allocation6 + $0x30] sm:$0xff]   ;;  %p862_p5 = scmp.lt.s32.totalorder %s558_s9, %s558_s9 }
  0x4d   :  { %647 = vmatprep.subr.bf16.mxu0 %v893_v0  ;;  %667 = vmatprep.subr.bf16.mxu1 %v893_v0  ;;  %v749_v12 = vld [vmem:[#allocation8 + $0x20] sm:$0xff]   ;;  %v743_v13 = vld [vmem:[#allocation6 + $0x38] sm:$0xff]   ;;  %v750_v14 = vld [vmem:[#allocation8 + $0x28] sm:$0xff]  }
  0x4e   :  { %v744_v15 = vld [vmem:[#allocation3] sm:$0xff]   ;;  %v751_v16 = vld [vmem:[#allocation8 + $0x30] sm:$0xff]   ;;  %v753_v18 = vld [vmem:[#allocation8 + $0x40] sm:$0xff]  }
  0x4f   :  { %v752_v17 = vld [vmem:[#allocation8 + $0x38] sm:$0xff]   ;;  %v754_v19 = vld [vmem:[#allocation8 + $0x48] sm:$0xff]   ;;  %v755_v20 = vld [vmem:[#allocation8 + $0x50] sm:$0xff]  }
  0x50   :  { %648 = vmatpush3.bf16.msra.mxu0 %v737_v2  ;;  %668 = vmatpush3.bf16.msra.mxu1 %v746_v6  ;;  %v756_v21 = vld [vmem:[#allocation8 + $0x58] sm:$0xff]   ;;  %v757_v22 = vld [vmem:[#allocation8 + $0x60] sm:$0xff]   ;;  %v758_v23 = vld [vmem:[#allocation8 + $0x68] sm:$0xff]  }
  0x51   :  { %649 = vmatprep.subr.bf16.mxu0 %v893_v0  ;;  %669 = vmatprep.subr.bf16.mxu1 %v893_v0  ;;  %v571_v24 = vld [vmem:[%s1078_s2] ss:$0 sm:$0xff]  ;;  %v759_v32 = vld [vmem:[#allocation8 + $0x70] sm:$0xff]   ;;  %v761_v34 = vld [vmem:[#allocation9] sm:$0xff]  }
  0x52   :  { %v760_v33 = vld [vmem:[#allocation8 + $0x78] sm:$0xff]   ;;  %v762_v35 = vld [vmem:[#allocation9 + $0x8] sm:$0xff]   ;;  %v763_v36 = vld [vmem:[#allocation9 + $0x10] sm:$0xff]  }
  0x53   :  { %v764_v37 = vld [vmem:[#allocation9 + $0x18] sm:$0xff]   ;;  %v765_v38 = vld [vmem:[#allocation9 + $0x20] sm:$0xff]   ;;  %v766_v39 = vld [vmem:[#allocation9 + $0x28] sm:$0xff]  }
  0x54   :  { %650 = vmatpush3.bf16.msra.mxu0 %v738_v3  ;;  %670 = vmatpush3.bf16.msra.mxu1 %v747_v8  ;;  %v581_v40 = vld [vmem:[%s1080_s4] ss:$0 sm:$0xff]  ;;  %v767_v48 = vld [vmem:[#allocation9 + $0x30] sm:$0xff]   ;;  %v591_v50 = vld [vmem:[%s1080_s4 + $0x1] ss:$0 sm:$0xff]  ;;  %s857_s4 = scalar_lea.vmem %s558_s9, 256 }
  0x55   :  { %651 = vmatprep.subr.bf16.mxu0 %v893_v0  ;;  %671 = vmatprep.subr.bf16.mxu1 %v893_v0  ;;  %v768_v49 = vld [vmem:[#allocation9 + $0x38] sm:$0xff]   ;;  %p858_p4 = scmp.ne.s32.totalorder %s558_s9, %s857_s4  ;;  %p863_p6 = scmp.lt.s32.totalorder %s857_s4, %s857_s4 }
  0x56   :  { %v600_v58 = vld [vmem:[%s1082_s6] ss:$0 sm:$0xff] }
  0x57   :  { %p864_p7 = por %p863_p6, %p862_p5 }
  0x58   :  { %652 = vmatpush3.bf16.msra.mxu0 %v739_v5  ;;  %672 = vmatpush3.bf16.msra.mxu1 %v748_v10 }
  0x59   :  { %653 = vmatprep.subr.bf16.mxu0 %v893_v0  ;;  %673 = vmatprep.subr.bf16.mxu1 %v893_v0  ;;  %p865_p8 = pnand %p864_p7, %p858_p4 }
  0x5c   :  { %654 = vmatpush3.bf16.msra.mxu0 %v740_v7  ;;  %674 = vmatpush3.bf16.msra.mxu1 %v749_v12 }
  0x5d   :  { %655 = vmatprep.subr.bf16.mxu0 %v893_v0  ;;  %675 = vmatprep.subr.bf16.mxu1 %v893_v0 }
  0x60   :  { %656 = vmatpush3.bf16.msra.mxu0 %v741_v9  ;;  %676 = vmatpush3.bf16.msra.mxu1 %v750_v14 }
  0x61   :  { %657 = vmatprep.subr.bf16.mxu0 %v893_v0  ;;  %677 = vmatprep.subr.bf16.mxu1 %v893_v0 }
  0x64   :  { %658 = vmatpush3.bf16.msra.mxu0 %v742_v11  ;;  %678 = vmatpush3.bf16.msra.mxu1 %v751_v16 }
  0x65   :  { %659 = vmatprep.subr.bf16.mxu0 %v893_v0  ;;  %679 = vmatprep.subr.bf16.mxu1 %v893_v0 }
  0x68   :  { %660 = vmatpush3.bf16.msra.mxu0 %v743_v13  ;;  %680 = vmatpush3.bf16.msra.mxu1 %v752_v17 }
  0x69   :  { %685 = vmatprep.subr.bf16.mxu0 %v893_v0  ;;  %705 = vmatprep.subr.bf16.mxu1 %v893_v0 }
  0x6b   :  { %662 = vmatmul.mubr.bf16.vlgmr.msra.gmra.mrb[0].mxu0 %v744_v15 }
  0x6c   :  { %701 = vmatprep.mubr.msk.bf16.mxu0 %vm894_vm0, %v893_v0  ;;  %686 = vmatpush3.bf16.msra.mxu0 %v753_v18 }
  0x6d   :  { %687 = vmatprep.subr.bf16.mxu0 %v893_v0 }
  0x70   :  { %688 = vmatpush3.bf16.msra.mxu0 %v754_v19 }
  0x71   :  { %689 = vmatprep.subr.bf16.mxu0 %v893_v0 }
  0x74   :  { %690 = vmatpush3.bf16.msra.mxu0 %v755_v20 }
  0x75   :  { %691 = vmatprep.subr.bf16.mxu0 %v893_v0 }
  0x78   :  { %692 = vmatpush3.bf16.msra.mxu0 %v756_v21 }
  0x79   :  { %693 = vmatprep.subr.bf16.mxu0 %v893_v0 }
  0x7c   :  { %694 = vmatpush3.bf16.msra.mxu0 %v757_v22 }
  0x7d   :  { %695 = vmatprep.subr.bf16.mxu0 %v893_v0 }
  0x80   :  { %696 = vmatpush3.bf16.msra.mxu0 %v758_v23 }
  0x81   :  { %697 = vmatprep.subr.bf16.mxu0 %v893_v0 }
  0x84   :  { %698 = vmatpush3.bf16.msra.mxu0 %v759_v32 }
  0x85   :  { %699 = vmatprep.subr.bf16.mxu0 %v893_v0 }
  0x88   :  { %700 = vmatpush3.bf16.msra.mxu0 %v760_v33 }
 0x13e   :  { %v196_v25 = vpop.f32.mrb[0].mxu0 }
 0x13f   :  { %v663_v26 = vpop.f32.mrb[1].mxu0  ;;  %v197_v28 = vadd.f32 %v571_v24, %v196_v25 }
 0x140   :  { %v199_v27 = vpop.f32.mrb[2].mxu0 }
 0x141   :  { %v200_v29 = vadd.f32 %v571_v24, %v199_v27  ;;  %v664_v30 = vpop.f32.mrb[3].mxu0 }
 0x143   :  { %v203_v31 = vpack.c.bf16 %v200_v29, %v197_v28 }
 0x145   :  { %682 = vmatmul.mubr.bf16.vlgmr.msra.gmra.mrb[0].mxu1 %v203_v31 }
 0x146   :  { %721 = vmatprep.mubr.msk.bf16.mxu1 %vm894_vm0, %v893_v0  ;;  %706 = vmatpush3.bf16.msra.mxu1 %v761_v34 }
 0x147   :  { %707 = vmatprep.subr.bf16.mxu1 %v893_v0 }
 0x14a   :  { %708 = vmatpush3.bf16.msra.mxu1 %v762_v35 }
 0x14b   :  { %709 = vmatprep.subr.bf16.mxu1 %v893_v0 }
 0x14e   :  { %710 = vmatpush3.bf16.msra.mxu1 %v763_v36 }
 0x14f   :  { %711 = vmatprep.subr.bf16.mxu1 %v893_v0 }
 0x152   :  { %712 = vmatpush3.bf16.msra.mxu1 %v764_v37 }
 0x153   :  { %713 = vmatprep.subr.bf16.mxu1 %v893_v0 }
 0x156   :  { %714 = vmatpush3.bf16.msra.mxu1 %v765_v38 }
 0x157   :  { %715 = vmatprep.subr.bf16.mxu1 %v893_v0 }
 0x15a   :  { %716 = vmatpush3.bf16.msra.mxu1 %v766_v39 }
 0x15b   :  { %717 = vmatprep.subr.bf16.mxu1 %v893_v0 }
 0x15e   :  { %718 = vmatpush3.bf16.msra.mxu1 %v767_v48 }
 0x15f   :  { %719 = vmatprep.subr.bf16.mxu1 %v893_v0 }
 0x162   :  { %720 = vmatpush3.bf16.msra.mxu1 %v768_v49 }
 0x218   :  { %v311_v41 = vpop.f32.mrb[0].mxu1 }
 0x219   :  { %v683_v42 = vpop.f32.mrb[1].mxu1  ;;  %v312_v44 = vadd.f32 %v581_v40, %v311_v41 }
 0x21a   :  { %v314_v43 = vpop.f32.mrb[2].mxu1 }
 0x21b   :  { %v315_v45 = vadd.f32 %v581_v40, %v314_v43  ;;  %v684_v46 = vpop.f32.mrb[3].mxu1 }
 0x21d   :  { %v318_v47 = vpack.c.bf16 %v315_v45, %v312_v44 }
 0x21f   :  { %702 = vmatmul.mubr.bf16.vlgmr.msra.gmra.mrb[4].mxu0 %v318_v47 }
 0x2f2   :  { %v428_v51 = vpop.f32.mrb[4].mxu0 }
 0x2f3   :  { %v703_v52 = vpop.f32.mrb[5].mxu0  ;;  %v429_v54 = vadd.f32 %v591_v50, %v428_v51 }
 0x2f4   :  { %v431_v53 = vpop.f32.mrb[6].mxu0 }
 0x2f5   :  { %v432_v55 = vadd.f32 %v591_v50, %v431_v53  ;;  %v704_v56 = vpop.f32.mrb[7].mxu0 }
 0x2f7   :  { %v435_v57 = vpack.c.bf16 %v432_v55, %v429_v54 }
 0x2f9   :  { %722 = vmatmul.mubr.bf16.vlgmr.msra.gmra.mrb[4].mxu1 %v435_v57 }
 0x3cc   :  { %v543_v59 = vpop.f32.mrb[4].mxu1 }
 0x3cd   :  { %v544_v60 = vadd.f32 %v600_v58, %v543_v59  ;;  %v723_v61 = vpop.f32.mrb[5].mxu1 }
 0x3ce   :  { %v546_v62 = vpop.f32.mrb[6].mxu1 }
 0x3cf   :  { %550 = vst [vmem:[#allocation11] sm:$0xff] %v544_v60  ;;  %v547_v63 = vadd.f32 %v600_v58, %v546_v62  ;;  %v724_v0 = vpop.f32.mrb[7].mxu1 }
 0x3d1   :  { %551 = vst [vmem:[#allocation11 + $0x8] sm:$0xff] %v547_v63 }
 0x3d2   :  { %868 = shalt.err (!%p865_p8)
}
 0x3d3   :  { %s869_s11 = scalar_lea.hbm %s1083_s7, 256 }
 0x3d4   :  { %p870_p9 = scmp.ne.s32.totalorder %s1083_s7, %s869_s11  ;;  %p873_p10 = scmp.lt.u32.totalorder %s869_s11, %s1083_s7 }
 0x3d6   :  { %p875_p11 = pnand %p873_p10, %p870_p9 }
 0x3d8   :  { %878 = shalt.err (!%p875_p11)
}
 0x3d9   :  { %s896_s27 = smov 128   ;;  %s897_s17 = smov 8  }
 0x3da   :  { %563 = dma.vmem_to_hbm [thread:$0]  %s558_s9, 256, %s1083_s7, [#allocation5], %s896_s27, %s896_s27, %s897_s17  }
 0x3db   :  { %885 = dma.done.wait [#allocation5], 256  }
 0x3dc   :  { %886 = vsyncadd [#allocation5], 4294967040 }
 0x3dd   :  { %567 = vsyncpa [#allocation4], 1 }
 0x3de   :  { %568 = vsyncpa [#allocation7], 1 }
 0x3df   :  { %569 = vsyncpa [#allocation10], 1 }
 0x3e0   :  { %570 = vsyncpa [#allocation5], 1 }

</bundles_post_ra>
